<compile_context>
chip_gen: v5e
topology: v5e:2x2
jax: 0.10.0
libtpu: 0.0.40
codegen_flags: <defaults>
</compile_context>

<pallas_src>
import functools

import jax
import jax.numpy as jnp
from jax.experimental import pallas as pl
from jax.experimental.pallas import tpu as pltpu


def _round_up(a: int, b: int) -> int:
    return ((a + b - 1) // b) * b


def _vmem_capacity_bytes() -> int:
    try:
        return int(pltpu.get_tpu_info().vmem_capacity_bytes)
    except Exception:
        return 64 << 20          # conservative: v7x per-TensorCore VMEM


def _choose_tile_rows(b_rows: int, n_classes: int, itemsize: int,
                      vmem_limit: int) -> int:
    """Row tile sized so one (rows, N) f32 working array is ~vmem_limit/8.

    Peak in-kernel VMEM is roughly 2x (double-buffered input block) plus
    ~3-4x (f32 intermediates) of that working array, so this keeps the total
    around 0.75 * vmem_limit on every generation.  Lane padding (N rounded up
    to 128) is included so the *physical* footprint is what gets budgeted.
    """
    work_bytes = vmem_limit // 8
    phys_cols = _round_up(n_classes, 128)          # lanes are padded to 128
    row_align = 8 if itemsize >= 4 else 16         # bf16 packs 16 rows/sublane tile
    rows = work_bytes // (phys_cols * 4)
    rows = max(row_align, (rows // row_align) * row_align)
    rows = min(rows, _round_up(b_rows, row_align))
    return max(row_align, rows)


def _smooth_ce_kernel(coef_ref, preds_ref, tgt_ref, out_ref, acc_ref,
                      *, c_smooth, total_rows, num_classes):
    """One streamed tile: stable LSE + single folded per-row contribution."""
    c = pl.program_id(0)                 # parallel split (v7x: one per TensorCore)
    s = pl.program_id(1)                 # sequential streaming axis
    steps = pl.num_programs(1)
    tb = acc_ref.shape[0]

    @pl.when(s == 0)
    def _init():
        acc_ref[...] = jnp.zeros_like(acc_ref)

    c_nll = coef_ref[0]                                    # (1 - eps) / count(t != 0)

    x = preds_ref[...].astype(jnp.float32)                 # (TB, N) f32 working copy
    t = tgt_ref[...]                                       # (TB, 1) int32

    # Rows past the true batch (zero padding) contribute nothing.
    row0 = (c * steps + s) * tb
    row_ids = row0 + jax.lax.broadcasted_iota(jnp.int32, (tb, 1), 0)
    row_mask = (row_ids < total_rows).astype(jnp.float32)              # (TB, 1)

    # Numerically stable log-sum-exp: the only lane (XLU) reductions left are
    # max, sum(exp) and one weighted row-sum below.
    m = jnp.max(x, axis=-1, keepdims=True)                             # (TB, 1)
    sum_e = jnp.sum(jnp.exp(x - m), axis=-1, keepdims=True)            # (TB, 1)
    lse = jnp.log(sum_e) + m                                           # (TB, 1)

    # ignore_index == 0 AND not a padded row.
    valid = jnp.where(t != 0, row_mask, 0.0)                           # (TB, 1)

    # Fold both loss terms (already scaled by eps/(N*B) and (1-eps)/cnt) into a
    # single per-row contribution:
    #   contrib_i = c_s*rm_i*(N*lse_i - sum_j x_ij) + c_n*v_i*(lse_i - x[i,t_i])
    #             = lse_i * alpha_i - sum_j x_ij * w_ij
    #   with w_ij = c_s*rm_i + c_n*v_i*[j == t_i],  alpha_i = c_s*N*rm_i + c_n*v_i
    alpha = (c_smooth * num_classes) * row_mask + c_nll * valid        # (TB, 1)
    col = jax.lax.broadcasted_iota(jnp.int32, x.shape, 1)              # (TB, N)
    w = c_smooth * row_mask + jnp.where(col == t, c_nll * valid, 0.0)  # (TB, N)
    wsum = jnp.sum(x * w, axis=-1, keepdims=True)                      # (TB, 1)

    # Single lane-sparse accumulator update per step; cross-sublane collapse
    # happens only once, in the epilogue.
    acc_ref[...] += lse * alpha - wsum

    @pl.when(s == steps - 1)
    def _finalize():
        partial = jnp.sum(acc_ref[...])
        # Lane-dense (1, 8, 128) partial-result block, one per parallel split;
        # the wrapper reads [:, 0, 0] and sums.
        out_ref[...] = jnp.full(out_ref.shape, partial, dtype=jnp.float32)


def smooth_cross_entropy_loss(preds, target, epsilon=0.01, tile_rows=None):
    """Pallas wrapper. preds: (..., N) float (f32 or bf16); target: (...) int.

    Matches the PyTorch module with reduction='mean'.  NOTE: if every target
    equals ignore_index (0), the NLL mean is 0/0 and the result is NaN, exactly
    like torch.nn.functional.nll_loss.
    """
    n = preds.shape[-1]
    x = preds.reshape(-1, n)
    t = target.reshape(-1).astype(jnp.int32)
    b = x.shape[0]

    vmem_cap = _vmem_capacity_bytes()
    vmem_limit = max(32 << 20, min(96 << 20, vmem_cap - (16 << 20)))

    row_align = 8 if x.dtype.itemsize >= 4 else 16
    if tile_rows is None:
        tile_rows = _choose_tile_rows(b, n, x.dtype.itemsize, vmem_limit)
    assert tile_rows % row_align == 0 and tile_rows >= row_align

    # Non-ignored row count, computed once in the wrapper (trivial XLA reduce)
    # so the kernel can fold (1 - eps)/cnt into the per-row contribution.
    cnt = jnp.sum((t != 0).astype(jnp.float32))
    coef = ((1.0 - float(epsilon)) / cnt).astype(jnp.float32).reshape(1)

    # Grid: (nsplit, steps).  nsplit=2 maps onto v7x's two TensorCores via the
    # "parallel" dimension semantic; on 1-TC chips it is just two sequential
    # chunks of the same streaming loop.
    num_blocks = -(-b // tile_rows)
    nsplit = 2 if num_blocks >= 2 else 1
    num_blocks = _round_up(num_blocks, nsplit)
    steps = num_blocks // nsplit
    b_pad = num_blocks * tile_rows

    if b_pad != b:
        # Padded rows: preds 0, target 0 (== ignore_index); masked in-kernel.
        x = jnp.pad(x, ((0, b_pad - b), (0, 0)))
        t = jnp.pad(t, (0, b_pad - b))
    t2 = t.reshape(-1, 1)

    kernel = functools.partial(
        _smooth_ce_kernel,
        c_smooth=float(epsilon) / (float(n) * float(b)),
        total_rows=int(b),
        num_classes=int(n),
    )

    out = pl.pallas_call(
        kernel,
        out_shape=jax.ShapeDtypeStruct((nsplit, 8, 128), jnp.float32),
        grid_spec=pltpu.PrefetchScalarGridSpec(
            num_scalar_prefetch=0,
            grid=(nsplit, steps),
            in_specs=[
                pl.BlockSpec(memory_space=pltpu.SMEM),                           # coef
                pl.BlockSpec((tile_rows, n), lambda c, s: (c * steps + s, 0)),   # preds
                pl.BlockSpec((tile_rows, 1), lambda c, s: (c * steps + s, 0)),   # target
            ],
            out_specs=pl.BlockSpec((1, 8, 128), lambda c, s: (c, 0, 0)),
            scratch_shapes=[
                pltpu.VMEM((tile_rows, 1), jnp.float32),   # single folded accumulator
            ],
        ),
        compiler_params=pltpu.CompilerParams(
            dimension_semantics=("parallel", "arbitrary"),
            vmem_limit_bytes=int(vmem_limit),
        ),
    )(coef, x, t2)

    return jnp.sum(out[:, 0, 0])


def _reference_loss(preds, target, epsilon=0.01):
    """Pure-JAX reference matching the PyTorch forward (reduction='mean')."""
    n = preds.shape[-1]
    x = preds.reshape(-1, n).astype(jnp.float32)
    logp = jax.nn.log_softmax(x, axis=-1)
    loss = (-logp.sum(axis=-1)).mean()
    t = target.reshape(-1).astype(jnp.int32)
    picked = jnp.take_along_axis(logp, t[:, None], axis=1)[:, 0]
    valid = t != 0
    nll = jnp.sum(jnp.where(valid, -picked, 0.0)) / jnp.sum(valid.astype(jnp.float32))
    return epsilon * (loss / n) + (1.0 - epsilon) * nll


if __name__ == "__main__":
    key = jax.random.PRNGKey(0)
    k1, k2, k3, k4, k5, k6 = jax.random.split(key, 6)

    # Case 1: f32, rows divide the tile exactly (single block).
    batch, seq, n_classes = 4, 8, 32                     # flattens to (32, 32)
    preds = jax.random.normal(k1, (batch, seq, n_classes), dtype=jnp.float32)
    target = jax.random.randint(k2, (batch, seq), 0, n_classes, dtype=jnp.int32)
    target = target.at[0, 0].set(3)                      # ensure >= 1 non-ignored target

    out = jax.block_until_ready(smooth_cross_entropy_loss(preds, target, epsilon=0.01))
    ref = _reference_loss(preds, target, epsilon=0.01)
    assert jnp.allclose(out, ref, atol=1e-5, rtol=1e-5), (out, ref)

    # Case 2: f32, ragged row count -> exercises padding + in-kernel row mask.
    batch2, seq2 = 3, 7                                  # flattens to (21, 32)
    preds2 = jax.random.normal(k3, (batch2, seq2, n_classes), dtype=jnp.float32)
    target2 = jax.random.randint(k4, (batch2, seq2), 0, n_classes, dtype=jnp.int32)
    target2 = target2.at[0, 0].set(5)

    out2 = jax.block_until_ready(smooth_cross_entropy_loss(preds2, target2, epsilon=0.01))
    ref2 = _reference_loss(preds2, target2, epsilon=0.01)
    assert jnp.allclose(out2, ref2, atol=1e-5, rtol=1e-5), (out2, ref2)

    # Case 3: bf16 streaming, multiple blocks -> exercises the (parallel,
    # arbitrary) grid split, multi-step accumulation and partial-sum combine.
    preds3 = jax.random.normal(k5, (4, 16, n_classes), dtype=jnp.float32).astype(jnp.bfloat16)
    target3 = jax.random.randint(k6, (4, 16), 0, n_classes, dtype=jnp.int32)
    target3 = target3.at[0, 0].set(7)

    out3 = jax.block_until_ready(
        smooth_cross_entropy_loss(preds3, target3, epsilon=0.1, tile_rows=16))
    ref3 = _reference_loss(preds3, target3, epsilon=0.1)
    assert jnp.allclose(out3, ref3, atol=1e-4, rtol=1e-4), (out3, ref3)

    print("KERNEL_OK")
</pallas_src>

<mosaic_0001>
module attributes {stable_mosaic.version = 11 : i64} {
  func.func @_smooth_ce_kernel(%arg0: i32, %arg1: i32, %arg2: memref<1xf32, #tpu.memory_space<smem>>, %arg3: memref<32x32xf32, #tpu.memory_space<vmem>>, %arg4: memref<32x1xi32, #tpu.memory_space<vmem>>, %arg5: memref<1x8x128xf32, #tpu.memory_space<vmem>>, %arg6: memref<32x1xf32, #tpu.memory_space<vmem>>) attributes {dimension_semantics = [#tpu.dimension_semantics<parallel>, #tpu.dimension_semantics<arbitrary>], iteration_bounds = array<i64: 1, 1>, scalar_prefetch = 0 : i64, scratch_operands = 1 : i64, tpu.core_type = #tpu.core_type<tc>, window_params = [{transform_indices = @transform_0, window_bounds = array<i64: 1>}, {transform_indices = @transform_1, window_bounds = array<i64: 32, 32>}, {transform_indices = @transform_2, window_bounds = array<i64: 32, 1>}, {transform_indices = @transform_3, window_bounds = array<i64: 1, 8, 128>}]} {
    %c0_i32 = arith.constant 0 : i32
    %0 = arith.cmpi eq, %arg1, %c0_i32 : i32
    %1 = arith.extui %0 : i1 to i32
    %c0_i32_0 = arith.constant 0 : i32
    %2 = arith.cmpi ne, %1, %c0_i32_0 : i32
    scf.if %2 {
      %cst_19 = arith.constant 0.000000e+00 : f32
      %58 = vector.broadcast %cst_19 : f32 to vector<32x1xf32>
      %c0_20 = arith.constant 0 : index
      %c0_21 = arith.constant 0 : index
      %59 = vector.load %arg6[%c0_20, %c0_21] : memref<32x1xf32, #tpu.memory_space<vmem>>, vector<32x1xf32>
      tpu.vector_store %arg6[%c0_20, %c0_21], %58 {strides = array<i32>} : memref<32x1xf32, #tpu.memory_space<vmem>>, vector<32x1xf32>,
    } else {
    }
    %c0 = arith.constant 0 : index
    %3 = memref.load %arg2[%c0] : memref<1xf32, #tpu.memory_space<smem>>
    %c0_1 = arith.constant 0 : index
    %c0_2 = arith.constant 0 : index
    %4 = vector.load %arg3[%c0_1, %c0_2] : memref<32x32xf32, #tpu.memory_space<vmem>>, vector<32x32xf32>
    %c0_3 = arith.constant 0 : index
    %c0_4 = arith.constant 0 : index
    %5 = vector.load %arg4[%c0_3, %c0_4] : memref<32x1xi32, #tpu.memory_space<vmem>>, vector<32x1xi32>
    %c1_i32 = arith.constant 1 : i32
    %6 = arith.muli %arg0, %c1_i32 : i32
    %7 = arith.addi %6, %arg1 : i32
    %c32_i32 = arith.constant 32 : i32
    %8 = arith.muli %7, %c32_i32 : i32
    %9 = tpu.iota {dimensions = array<i32: 0>} : vector<32x1xi32>
    %10 = vector.broadcast %8 : i32 to vector<32x1xi32>
    %11 = arith.addi %10, %9 : vector<32x1xi32>
    %c32_i32_5 = arith.constant 32 : i32
    %12 = vector.broadcast %c32_i32_5 : i32 to vector<32x1xi32>
    %13 = arith.cmpi slt, %11, %12 : vector<32x1xi32>
    %14 = arith.extui %13 : vector<32x1xi1> to vector<32x1xi32>
    %15 = arith.sitofp %14 : vector<32x1xi32> to vector<32x1xf32>
    %cst = arith.constant dense<0xFF800000> : vector<32xf32>
    %16 = vector.multi_reduction <maximumf>, %4, %cst [1] : vector<32x32xf32> to vector<32xf32>
    %17 = vector.shape_cast %16 : vector<32xf32> to vector<32x1xf32>
    %18 = vector.broadcast %17 : vector<32x1xf32> to vector<32x32xf32>
    %19 = arith.subf %4, %18 : vector<32x32xf32>
    %20 = math.exp %19 : vector<32x32xf32>
    %cst_6 = arith.constant dense<0.000000e+00> : vector<32xf32>
    %21 = vector.multi_reduction <add>, %20, %cst_6 [1] : vector<32x32xf32> to vector<32xf32>
    %22 = vector.shape_cast %21 : vector<32xf32> to vector<32x1xf32>
    %23 = math.log %22 : vector<32x1xf32>
    %24 = arith.addf %23, %17 : vector<32x1xf32>
    %c0_i32_7 = arith.constant 0 : i32
    %25 = vector.broadcast %c0_i32_7 : i32 to vector<32x1xi32>
    %26 = arith.cmpi ne, %5, %25 : vector<32x1xi32>
    %cst_8 = arith.constant 0.000000e+00 : f32
    %27 = vector.broadcast %cst_8 : f32 to vector<32x1xf32>
    %28 = arith.select %26, %15, %27 : vector<32x1xi1>, vector<32x1xf32>
    %cst_9 = arith.constant 3.125000e-04 : f32
    %29 = vector.broadcast %cst_9 : f32 to vector<32x1xf32>
    %30 = arith.mulf %29, %15 : vector<32x1xf32>
    %31 = vector.broadcast %3 : f32 to vector<32x1xf32>
    %32 = arith.mulf %31, %28 : vector<32x1xf32>
    %33 = arith.addf %30, %32 : vector<32x1xf32>
    %34 = tpu.iota {dimensions = array<i32: 1>} : vector<32x32xi32>
    %cst_10 = arith.constant 9.76562478E-6 : f32
    %35 = vector.broadcast %cst_10 : f32 to vector<32x1xf32>
    %36 = arith.mulf %35, %15 : vector<32x1xf32>
    %37 = vector.broadcast %5 : vector<32x1xi32> to vector<32x32xi32>
    %38 = arith.cmpi eq, %34, %37 : vector<32x32xi32>
    %39 = vector.broadcast %3 : f32 to vector<32x1xf32>
    %40 = arith.mulf %39, %28 : vector<32x1xf32>
    %cst_11 = arith.constant 0.000000e+00 : f32
    %41 = vector.shape_cast %40 : vector<32x1xf32> to vector<32x1xf32>
    %42 = vector.broadcast %41 : vector<32x1xf32> to vector<32x32xf32>
    %43 = vector.broadcast %cst_11 : f32 to vector<32x32xf32>
    %44 = arith.select %38, %42, %43 : vector<32x32xi1>, vector<32x32xf32>
    %45 = vector.broadcast %36 : vector<32x1xf32> to vector<32x32xf32>
    %46 = arith.addf %45, %44 : vector<32x32xf32>
    %47 = arith.mulf %4, %46 : vector<32x32xf32>
    %cst_12 = arith.constant dense<0.000000e+00> : vector<32xf32>
    %48 = vector.multi_reduction <add>, %47, %cst_12 [1] : vector<32x32xf32> to vector<32xf32>
    %49 = vector.shape_cast %48 : vector<32xf32> to vector<32x1xf32>
    %c0_13 = arith.constant 0 : index
    %c0_14 = arith.constant 0 : index
    %50 = vector.load %arg6[%c0_13, %c0_14] : memref<32x1xf32, #tpu.memory_space<vmem>>, vector<32x1xf32>
    %51 = arith.mulf %24, %33 : vector<32x1xf32>
    %52 = arith.subf %51, %49 : vector<32x1xf32>
    %53 = arith.addf %50, %52 : vector<32x1xf32>
    %c0_15 = arith.constant 0 : index
    %c0_16 = arith.constant 0 : index
    %54 = vector.load %arg6[%c0_15, %c0_16] : memref<32x1xf32, #tpu.memory_space<vmem>>, vector<32x1xf32>
    tpu.vector_store %arg6[%c0_15, %c0_16], %53 {strides = array<i32>} : memref<32x1xf32, #tpu.memory_space<vmem>>, vector<32x1xf32>,
    %c0_i32_17 = arith.constant 0 : i32
    %55 = arith.cmpi eq, %arg1, %c0_i32_17 : i32
    %56 = arith.extui %55 : i1 to i32
    %c0_i32_18 = arith.constant 0 : i32
    %57 = arith.cmpi ne, %56, %c0_i32_18 : i32
    scf.if %57 {
      %c0_19 = arith.constant 0 : index
      %c0_20 = arith.constant 0 : index
      %58 = vector.load %arg6[%c0_19, %c0_20] : memref<32x1xf32, #tpu.memory_space<vmem>>, vector<32x1xf32>
      %59 = vector.shape_cast %58 : vector<32x1xf32> to vector<1x32x1xf32>
      %cst_21 = arith.constant dense<0.000000e+00> : vector<1xf32>
      %60 = vector.multi_reduction <add>, %59, %cst_21 [1, 2] : vector<1x32x1xf32> to vector<1xf32>
      %61 = vector.shape_cast %60 : vector<1xf32> to vector<1x1x1xf32>
      %62 = vector.extract %61[0, 0, 0] : f32 from vector<1x1x1xf32>
      %63 = vector.broadcast %62 : f32 to vector<1x8x128xf32>
      %c0_22 = arith.constant 0 : index
      %c0_23 = arith.constant 0 : index
      %c0_24 = arith.constant 0 : index
      %64 = vector.load %arg5[%c0_22, %c0_23, %c0_24] : memref<1x8x128xf32, #tpu.memory_space<vmem>>, vector<1x8x128xf32>
      tpu.vector_store %arg5[%c0_22, %c0_23, %c0_24], %63 {strides = array<i32>} : memref<1x8x128xf32, #tpu.memory_space<vmem>>, vector<1x8x128xf32>,
    } else {
    }
    return
  }
  func.func @transform_0(%arg0: i32, %arg1: i32) -> i32 {
    %c0_i32 = arith.constant 0 : i32
    %c0_i32_0 = arith.constant 0 : i32
    return %c0_i32 : i32
  }
  func.func @transform_1(%arg0: i32, %arg1: i32) -> (i32, i32) {
    %c1_i32 = arith.constant 1 : i32
    %0 = arith.muli %arg0, %c1_i32 : i32
    %1 = arith.addi %0, %arg1 : i32
    %c0_i32 = arith.constant 0 : i32
    %c0_i32_0 = arith.constant 0 : i32
    return %1, %c0_i32 : i32, i32
  }
  func.func @transform_2(%arg0: i32, %arg1: i32) -> (i32, i32) {
    %c1_i32 = arith.constant 1 : i32
    %0 = arith.muli %arg0, %c1_i32 : i32
    %1 = arith.addi %0, %arg1 : i32
    %c0_i32 = arith.constant 0 : i32
    %c0_i32_0 = arith.constant 0 : i32
    return %1, %c0_i32 : i32, i32
  }
  func.func @transform_3(%arg0: i32, %arg1: i32) -> (i32, i32, i32) {
    %c0_i32 = arith.constant 0 : i32
    %c0_i32_0 = arith.constant 0 : i32
    %c0_i32_1 = arith.constant 0 : i32
    return %arg0, %c0_i32, %c0_i32_0 : i32, i32, i32
  }
}

</mosaic_0001>

<bundles_post_ra>
// kernel: tpu_custom_call.1
= control target key start
LH: loop header
LB: loop body
LE: loop exit
PB: predicated region body
PF: predicated region fallthrough
CT: control target
= control target key end

     0   :  { %vm102_vm0 = vcmask 261120   ;;  %v362_v3 = vmov 0   ;;  %s499_s0 = inlined_call_operand.<no memory space> [shape: f32[1], index: 0, kind: input, shape index: {}]   ;;  %s500_s1 = inlined_call_operand.vmem [shape: f32[32,32], index: 1, kind: input, shape index: {}]   ;;  %s501_s2 = inlined_call_operand.vmem [shape: s32[32,1], index: 2, kind: input, shape index: {}]   ;;  %s502_s3 = inlined_call_operand.hbm [shape: f32[1,8,128], index: 3, kind: output, shape index: {}]  }
   0x1   :  { %v74_v0 = vld [vmem:[%s501_s2] sm:$0xff]  ;;  %v391_v1 = vld [vmem:[%s500_s1 + $0x10] sm:$0xff]  ;;  %317 = vset.pattern.permute.xlu2 %v362_v3  ;;  %318 = vset.pattern.permute.xlu0 %v362_v3 }
   0x2   :  { %v396_v2 = vld [vmem:[%s500_s1] sm:$0xff]  ;;  %v109_v4 = vsel %vm102_vm0, %v391_v1, -inf  ;;  %179 = vperm.xlu2 %317, %v74_v0   ;;  %319 = vset.pattern.permute.xlu1 %v362_v3 }
   0x3   :  { %v103_v5 = vsel %vm102_vm0, %v396_v2, -inf  ;;  %110 = vmax.xlane.f32.xlu1 %v109_v4 }
   0x4   :  { %104 = vmax.xlane.f32.xlu0 %v103_v5 }
   0x5   :  { %9 = vsyncpa [#allocation5], 0  ;;  %v405_v6 = vld [vmem:[%s500_s1 + $0x18] sm:$0xff]  ;;  %v410_v7 = vld [vmem:[%s500_s1 + $0x8] sm:$0xff]  ;;  %v163_v12 = vstv %s499_s0  ;;  %v363_v13 = vmov 0.0   ;;  %vm151_vm2 = vcmp.ne.s32.totalorder %v74_v0, 0  ;;  %v172_v35 = vlaneseq }
   0x6   :  { %v75_v8 = vld [vmem:[%s501_s2 + $0x8] sm:$0xff]  ;;  %v112_v9 = vsel %vm102_vm0, %v405_v6, -inf  ;;  %v106_v10 = vsel %vm102_vm0, %v410_v7, -inf  ;;  %v76_v11 = vld [vmem:[%s501_s2 + $0x10] sm:$0xff]  ;;  %v155_v16 = vsel %vm151_vm2, 1.0, %v363_v13  ;;  %v77_v19 = vld [vmem:[%s501_s2 + $0x18] sm:$0xff] }
   0x7   :  { %vm153_vm1 = vcmp.ne.s32.totalorder %v76_v11, 0  ;;  %vm152_vm3 = vcmp.ne.s32.totalorder %v75_v8, 0  ;;  %v430_v17 = vmul.f32 %v163_v12, %v155_v16  ;;  %vm154_vm4 = vcmp.ne.s32.totalorder %v77_v19, 0  ;;  %s364_s0 = smov [#allocation4]   ;;  %s291_s4 = sshll.u32 %s502_s3, 4  ;;  %s292_s4 = int_to_ptr.hbm [resolvable:$true] %s291_s4 }
   0x8   :  { %v157_v14 = vsel %vm153_vm1, 1.0, %v363_v13  ;;  %v156_v18 = vsel %vm152_vm3, 1.0, %v363_v13  ;;  %v158_v21 = vsel %vm154_vm4, 1.0, %v363_v13  ;;  %v173_v44 = vand.u32 127, %v172_v35  ;;  %s289_s2 = sshll.u32 %s364_s0, 4  ;;  %s290_s2 = int_to_ptr.vmem [resolvable:$true] %s289_s2 }
   0x9   :  { %v426_v15 = vmul.f32 %v163_v12, %v157_v14  ;;  %v437_v20 = vmul.f32 %v163_v12, %v156_v18  ;;  %v441_v22 = vmul.f32 %v163_v12, %v158_v21  ;;  %vm64_vm9 = vcmask 7168  }
   0xa   :  { %182 = vperm.xlu2 %317, %v75_v8   ;;  %68 = vst.msk [vmem:[#allocation2 + $0x18] sm:$0xff] %vm64_vm9, %v363_v13  ;;  %v168_v18 = vadd.f32 0.0003125, %v430_v17 }
   0xb   :  { %113 = vmax.xlane.f32.xlu1 %v112_v9  ;;  %65 = vst.msk [vmem:[#allocation2] sm:$0xff] %vm64_vm9, %v363_v13 }
   0xc   :  { %107 = vmax.xlane.f32.xlu0 %v106_v10  ;;  %66 = vst.msk [vmem:[#allocation2 + $0x8] sm:$0xff] %vm64_vm9, %v363_v13 }
   0xd   :  { %67 = vst.msk [vmem:[#allocation2 + $0x10] sm:$0xff] %vm64_vm9, %v363_v13  ;;  %v171_v13 = vadd.f32 0.0003125, %v441_v22 }
  0x12   :  { %185 = vperm.xlu2 %317, %v76_v11  }
  0x1a   :  { %206 = vperm.xlu2 %317, %v426_v15  }
  0x20   :  { %196 = vperm.xlu0 %318, %v430_v17  }
  0x22   :  { %188 = vperm.xlu2 %317, %v77_v19  }
  0x24   :  { %201 = vperm.xlu1 %319, %v437_v20  }
  0x2a   :  { %211 = vperm.xlu2 %317, %v441_v22   ;;  %v170_v22 = vadd.f32 0.0003125, %v426_v15 }
  0x5c   :  { %v180_v23 = vpop.permute.xlu2 %179 }
  0x5d   :  { %vm190_vm6 = vcmp.eq.s32.totalorder %v173_v44, %v180_v23 }
  0x64   :  { %v183_v24 = vpop.permute.xlu2 %182 }
  0x65   :  { %vm191_vm8 = vcmp.eq.s32.totalorder %v173_v44, %v183_v24 }
  0x6c   :  { %v186_v25 = vpop.permute.xlu2 %185 }
  0x6d   :  { %vm192_vm7 = vcmp.eq.s32.totalorder %v173_v44, %v186_v25 }
  0x74   :  { %v207_v26 = vpop.permute.xlu2 %206 }
  0x75   :  { %v216_v58 = vsel %vm192_vm7, %v207_v26, 0.0 }
  0x76   :  { %v444_v27 = vpop.xlane.xlu1 %110  ;;  %v220_v62 = vadd.f32 9.765625e-06, %v216_v58 }
  0x77   :  { %v117_v28 = vsub.f32 %v391_v1, %v444_v27  ;;  %v448_v29 = vpop.xlane.xlu0 %104 }
  0x78   :  { %v115_v30 = vsub.f32 %v396_v2, %v448_v29  ;;  %v224_v5 = vmul.f32 %v220_v62, %v391_v1 }
  0x79   :  { %v123_v31 = vmul.f32 1.442695, %v117_v28  ;;  %v169_v28 = vadd.f32 0.0003125, %v437_v20 }
  0x7a   :  { %v119_v32 = vmul.f32 1.442695, %v115_v30 }
  0x7b   :  { %320 = vpow2.f32 %v123_v31 }
  0x7c   :  { %322 = vpow2.f32 %v119_v32  ;;  %v189_v33 = vpop.permute.xlu2 %188  ;;  %v238_v32 = vld [vmem:[#allocation2] sm:$0xff] }
  0x7d   :  { %vm193_vm5 = vcmp.eq.s32.totalorder %v173_v44, %v189_v33  ;;  %v240_v44 = vld [vmem:[#allocation2 + $0x10] sm:$0xff] }
  0x7e   :  { %v452_v34 = vpop.xlane.xlu1 %113 }
  0x7f   :  { %v118_v36 = vsub.f32 %v405_v6, %v452_v34  ;;  %v456_v37 = vpop.xlane.xlu0 %107 }
  0x80   :  { %v116_v38 = vsub.f32 %v410_v7, %v456_v37 }
  0x81   :  { %v321_v39 = vpop.eup %320  ;;  %v125_v40 = vmul.f32 1.442695, %v118_v36 }
  0x82   :  { %v323_v41 = vpop.eup %322  ;;  %v121_v42 = vmul.f32 1.442695, %v116_v38  ;;  %v133_v43 = vsel %vm102_vm0, %v321_v39, 0.0 }
  0x83   :  { %324 = vpow2.f32 %v125_v40  ;;  %v127_v45 = vsel %vm102_vm0, %v323_v41, 0.0  ;;  %134 = vadd.xlane.f32.xlu0 %v133_v43  ;;  %v239_v41 = vld [vmem:[#allocation2 + $0x8] sm:$0xff] }
  0x84   :  { %326 = vpow2.f32 %v121_v42  ;;  %128 = vadd.xlane.f32.xlu1 %v127_v45  ;;  %v212_v46 = vpop.permute.xlu2 %211 }
  0x85   :  { %v217_v47 = vsel %vm193_vm5, %v212_v46, 0.0 }
  0x86   :  { %v221_v48 = vadd.f32 9.765625e-06, %v217_v47 }
  0x88   :  { %v225_v50 = vmul.f32 %v221_v48, %v405_v6  ;;  %v232_v6 = vsel %vm102_vm0, %v224_v5, 0.0 }
  0x89   :  { %v325_v49 = vpop.eup %324 }
  0x8a   :  { %v327_v51 = vpop.eup %326  ;;  %v136_v52 = vsel %vm102_vm0, %v325_v49, 0.0  ;;  %v235_v54 = vsel %vm102_vm0, %v225_v50, 0.0 }
  0x8b   :  { %v130_v53 = vsel %vm102_vm0, %v327_v51, 0.0  ;;  %236 = vadd.xlane.f32.xlu0 %v235_v54 }
  0x8c   :  { %131 = vadd.xlane.f32.xlu2 %v130_v53  ;;  %137 = vadd.xlane.f32.xlu1 %v136_v52 }
  0x92   :  { %v197_v55 = vpop.permute.xlu0 %196 }
  0x93   :  { %v214_v56 = vsel %vm190_vm6, %v197_v55, 0.0 }
  0x94   :  { %v218_v57 = vadd.f32 9.765625e-06, %v214_v56 }
  0x96   :  { %v202_v59 = vpop.permute.xlu1 %201  ;;  %v222_v60 = vmul.f32 %v218_v57, %v396_v2 }
  0x97   :  { %v215_v61 = vsel %vm191_vm8, %v202_v59, 0.0 }
  0x98   :  { %v219_v63 = vadd.f32 9.765625e-06, %v215_v61  ;;  %v226_v0 = vsel %vm102_vm0, %v222_v60, 0.0 }
  0x99   :  { %227 = vadd.xlane.f32.xlu2 %v226_v0 }
  0x9a   :  { %v223_v3 = vmul.f32 %v219_v63, %v410_v7 }
  0x9c   :  { %v229_v4 = vsel %vm102_vm0, %v223_v3, 0.0 }
  0x9d   :  { %230 = vadd.xlane.f32.xlu1 %v229_v4 }
  0xa1   :  { %233 = vadd.xlane.f32.xlu2 %v232_v6 }
  0xf6   :  { %v135_v1 = vpop.xlane.xlu0 %134 }
  0xf7   :  { %v129_v2 = vpop.xlane.xlu1 %128 }
  0xf8   :  { %328 = vlog2.f32 %v129_v2 }
  0xfe   :  { %v329_v9 = vpop.eup %328  ;;  %v237_v33 = vpop.xlane.xlu0 %236 }
  0xff   :  { %v132_v7 = vpop.xlane.xlu2 %131  ;;  %v138_v8 = vpop.xlane.xlu1 %137  ;;  %v140_v10 = vmul.f32 0.6931472, %v329_v9 }
 0x100   :  { %330 = vlog2.f32 %v132_v7 }
 0x101   :  { %332 = vlog2.f32 %v138_v8  ;;  %v147_v14 = vadd.f32 %v140_v10, %v448_v29  ;;  %v241_v29 = vld [vmem:[#allocation2 + $0x18] sm:$0xff] }
 0x102   :  { %334 = vlog2.f32 %v135_v1 }
 0x103   :  { %v242_v26 = vmul.f32 %v168_v18, %v147_v14 }
 0x106   :  { %v331_v11 = vpop.eup %330 }
 0x107   :  { %v333_v12 = vpop.eup %332  ;;  %v142_v16 = vmul.f32 0.6931472, %v331_v11 }
 0x108   :  { %v335_v19 = vpop.eup %334  ;;  %v146_v21 = vmul.f32 0.6931472, %v333_v12 }
 0x109   :  { %v144_v24 = vmul.f32 0.6931472, %v335_v19  ;;  %v148_v25 = vadd.f32 %v142_v16, %v456_v37 }
 0x10a   :  { %v150_v23 = vadd.f32 %v146_v21, %v452_v34 }
 0x10b   :  { %v149_v17 = vadd.f32 %v144_v24, %v444_v27  ;;  %v243_v39 = vmul.f32 %v169_v28, %v148_v25 }
 0x10c   :  { %v245_v30 = vmul.f32 %v171_v13, %v150_v23  ;;  %v228_v31 = vpop.xlane.xlu2 %227 }
 0x10d   :  { %v246_v35 = vsub.f32 %v242_v26, %v228_v31  ;;  %v244_v42 = vmul.f32 %v170_v22, %v149_v17 }
 0x10e   :  { %v249_v36 = vsub.f32 %v245_v30, %v237_v33 }
 0x10f   :  { %v250_v38 = vadd.f32 %v246_v35, %v238_v32 }
 0x110   :  { %v253_v34 = vadd.f32 %v249_v36, %v241_v29  ;;  %v231_v40 = vpop.xlane.xlu1 %230 }
 0x111   :  { %255 = vst.msk [vmem:[#allocation2] sm:$0xff] %vm64_vm9, %v250_v38  ;;  %v247_v37 = vsub.f32 %v243_v39, %v231_v40 }
 0x112   :  { %258 = vst.msk [vmem:[#allocation2 + $0x18] sm:$0xff] %vm64_vm9, %v253_v34 }
 0x113   :  { %v251_v20 = vadd.f32 %v247_v37, %v239_v41 }
 0x114   :  { %v234_v43 = vpop.xlane.xlu2 %233 }
 0x115   :  { %256 = vst.msk [vmem:[#allocation2 + $0x8] sm:$0xff] %vm64_vm9, %v251_v20  ;;  %v248_v45 = vsub.f32 %v244_v42, %v234_v43 }
 0x117   :  { %v252_v27 = vadd.f32 %v248_v45, %v240_v44 }
 0x118   :  { %v262_v46 = vld [vmem:[#allocation2] sm:$0xff] }
 0x119   :  { %257 = vst.msk [vmem:[#allocation2 + $0x10] sm:$0xff] %vm64_vm9, %v252_v27  ;;  %v266_v47 = vsel %vm64_vm9, %v262_v46, 0.0  ;;  %v265_v51 = vld [vmem:[#allocation2 + $0x18] sm:$0xff] }
 0x11a   :  { %v271_v54 = vsel %vm64_vm9, %v265_v51, 0.0 }
 0x11c   :  { %v263_v15 = vld [vmem:[#allocation2 + $0x8] sm:$0xff] }
 0x11d   :  { %v267_v48 = vsel %vm64_vm9, %v263_v15, 0.0 }
 0x11e   :  { %v268_v49 = vadd.f32 %v267_v48, %v266_v47 }
 0x120   :  { %v264_v50 = vld [vmem:[#allocation2 + $0x10] sm:$0xff] }
 0x121   :  { %v269_v52 = vsel %vm64_vm9, %v264_v50, 0.0 }
 0x122   :  { %v270_v53 = vadd.f32 %v269_v52, %v268_v49 }
 0x124   :  { %v272_v55 = vadd.f32 %v271_v54, %v270_v53 }
 0x126   :  { %273 = vadd.xlane.f32.xlu1 %v272_v55 }
 0x199   :  { %v274_v56 = vpop.xlane.xlu1 %273 }
 0x19a   :  { %v275_v57 = vrot.slane %v274_v56, 4 }
 0x19c   :  { %v276_v58 = vadd.f32 %v275_v57, %v274_v56 }
 0x19e   :  { %v277_v59 = vrot.slane %v276_v58, 2 }
 0x1a0   :  { %v278_v60 = vadd.f32 %v277_v59, %v276_v58 }
 0x1a2   :  { %v279_v61 = vrot.slane %v278_v60, 1 }
 0x1a4   :  { %v280_v62 = vadd.f32 %v279_v61, %v278_v60 }
 0x1a6   :  { %312 = vpush %v280_v62 }
 0x1d7   :  { %s313_s5 = spop %312 }
 0x1d8   :  { %v282_v63 = vstv %s313_s5 }
 0x1d9   :  { %283 = vst [vmem:[#allocation4] sm:$0xff] %v282_v63 }
 0x1da   :  { %294 = dma.vmem_to_hbm [thread:$0]  %s290_s2, 128, %s292_s4, [#allocation5]  }
 0x1db   :  { %360 = dma.done.wait [#allocation5], 128  }
 0x1dc   :  { %361 = vsyncadd [#allocation5], 4294967168 }
 0x1dd   :  { %299 = vsyncpa [#allocation5], 1 }

</bundles_post_ra>
